<compile_context>
chip_gen: v7x
topology: tpu7x:2x2x1
jax: 0.10.0
libtpu: 0.0.40
codegen_flags: <defaults>
</compile_context>

<pallas_src>
import jax
import jax.numpy as jnp
from jax.experimental import pallas as pl
from jax.experimental.pallas import tpu as pltpu


def _full_spec(shape):
    # Whole-array block (single grid point); index_map takes no grid args.
    return pl.BlockSpec(shape, lambda: tuple(0 for _ in shape))


# --------------------------------------------------------------------------
# Fused BYOL forward kernel: z1, z2, p1, p2 in a single launch.
# --------------------------------------------------------------------------
def byol_fused_kernel(
    x1_ref, x2_ref,
    ow1_ref, ob1_ref, ow2_ref, ob2_ref,      # online network params
    tw1_ref, tb1_ref, tw2_ref, tb2_ref,      # target network params
    pw1_ref, pb1_ref, pw2_ref, pb2_ref,      # predictor network params
    z1_ref, z2_ref, p1_ref, p2_ref,
):
    # TODO(synk): at production BYOL head sizes (D_in~2048, hidden~4096) replace
    # these whole-array blocks with a tiled (M, N, K) grid + f32 VMEM accumulator
    # and bf16 operands, sized for 64 MiB VMEM on v7x / 128 MiB on v5e/v6e.
    def mlp(x, w1_ref, b1_ref, w2_ref, b2_ref):
        h = jnp.dot(x, w1_ref[...], preferred_element_type=jnp.float32)
        h = jnp.maximum(h + b1_ref[...], 0.0)          # (M,H) + (1,H) broadcast
        out = jnp.dot(h, w2_ref[...], preferred_element_type=jnp.float32)
        return out + b2_ref[...]

    z1 = mlp(x1_ref[...], ow1_ref, ob1_ref, ow2_ref, ob2_ref)
    z2 = mlp(x2_ref[...], tw1_ref, tb1_ref, tw2_ref, tb2_ref)
    z1_ref[...] = z1.astype(z1_ref.dtype)
    z2_ref[...] = z2.astype(z2_ref.dtype)

    # Batched predictor: reuse the (already VMEM-resident) predictor weights
    # once for both branches; 2B rows per MXU pass instead of B.
    b = z1.shape[0]
    z_all = jnp.concatenate([z1, z2], axis=0)           # (2B, O), sublane-aligned
    p_all = mlp(z_all, pw1_ref, pb1_ref, pw2_ref, pb2_ref)
    p1_ref[...] = p_all[:b].astype(p1_ref.dtype)
    p2_ref[...] = p_all[b:].astype(p2_ref.dtype)


def byol_fused_forward(online_params, target_params, predictor_params, x1, x2):
    B, D = x1.shape
    O = online_params[2].shape[1]
    param_specs = []
    for params in (online_params, target_params, predictor_params):
        param_specs += [_full_spec(p.shape) for p in params]
    out_shape = tuple(jax.ShapeDtypeStruct((B, O), jnp.float32) for _ in range(4))
    return pl.pallas_call(
        byol_fused_kernel,
        out_shape=out_shape,
        in_specs=[_full_spec((B, D)), _full_spec((B, D))] + param_specs,
        out_specs=tuple(_full_spec((B, O)) for _ in range(4)),
    )(x1, x2, *online_params, *target_params, *predictor_params)


# --------------------------------------------------------------------------
# Fused EMA update: all 4 target params in one launch, in-place via aliasing.
# --------------------------------------------------------------------------
def ema_fused_kernel(
    decay_ref,
    tw1_ref, tb1_ref, tw2_ref, tb2_ref,      # current target params
    ow1_ref, ob1_ref, ow2_ref, ob2_ref,      # online params
    nw1_ref, nb1_ref, nw2_ref, nb2_ref,      # new target params (alias targets)
):
    d = decay_ref[0]
    m = 1.0 - d
    # target <- decay * target + (1 - decay) * online   (update_ema_jit)
    nw1_ref[...] = d * tw1_ref[...] + m * ow1_ref[...]
    nb1_ref[...] = d * tb1_ref[...] + m * ob1_ref[...]
    nw2_ref[...] = d * tw2_ref[...] + m * ow2_ref[...]
    nb2_ref[...] = d * tb2_ref[...] + m * ob2_ref[...]


def ema_update_all(target_params, online_params, ema_decay):
    decay = jnp.asarray(ema_decay, jnp.float32).reshape((1,))
    in_specs = [pl.BlockSpec(memory_space=pltpu.MemorySpace.SMEM)]
    in_specs += [_full_spec(p.shape) for p in target_params]
    in_specs += [_full_spec(p.shape) for p in online_params]
    out_shape = tuple(jax.ShapeDtypeStruct(p.shape, jnp.float32) for p in target_params)
    return pl.pallas_call(
        ema_fused_kernel,
        out_shape=out_shape,
        in_specs=in_specs,
        out_specs=tuple(_full_spec(p.shape) for p in target_params),
        # Inputs 1..4 (target params) alias outputs 0..3: in-place EMA update.
        input_output_aliases={1: 0, 2: 1, 3: 2, 4: 3},
    )(decay, *target_params, *online_params)


# --------------------------------------------------------------------------
# BYOL.forward / BYOL.compute_loss
# --------------------------------------------------------------------------
def byol_forward(online_params, target_params, predictor_params, x1, x2, ema_decay):
    """Mirrors BYOL.forward: returns (z1, z2, p1, p2) and EMA-updated target params."""
    z1, z2, p1, p2 = byol_fused_forward(
        online_params, target_params, predictor_params, x1, x2
    )
    # update_target_network() — happens after the forward, matching PyTorch order.
    new_target_params = ema_update_all(target_params, online_params, ema_decay)
    return (z1, z2, p1, p2), new_target_params


byol_forward_jit = jax.jit(byol_forward)


def byol_compute_loss(z1, z2, p1, p2):
    """Plain-JAX reference of BYOL.compute_loss (normalizes z only, like PyTorch)."""
    b = z1.shape[0]
    z1n = z1.reshape(b, -1)
    z2n = z2.reshape(b, -1)
    z1n = z1n / jnp.maximum(jnp.linalg.norm(z1n, axis=-1, keepdims=True), 1e-12)
    z2n = z2n / jnp.maximum(jnp.linalg.norm(z2n, axis=-1, keepdims=True), 1e-12)
    loss = jnp.sum((p1 - z2n) ** 2) + jnp.sum((p2 - z1n) ** 2)
    return loss / b


# --------------------------------------------------------------------------
# Deterministic parameter init
# --------------------------------------------------------------------------
def init_mlp_params(key, d_in, d_hidden, d_out):
    k1, k2 = jax.random.split(key)
    w1 = jax.random.normal(k1, (d_in, d_hidden), jnp.float32) * 0.02
    b1 = jnp.zeros((1, d_hidden), jnp.float32)
    w2 = jax.random.normal(k2, (d_hidden, d_out), jnp.float32) * 0.02
    b2 = jnp.zeros((1, d_out), jnp.float32)
    return (w1, b1, w2, b2)


if __name__ == "__main__":
    B, D_IN, D_HID, D_OUT = 8, 128, 128, 128
    EMA_DECAY = 0.996

    key = jax.random.PRNGKey(0)
    k_online, k_pred, k_x1, k_x2 = jax.random.split(key, 4)

    online_params = init_mlp_params(k_online, D_IN, D_HID, D_OUT)
    # target_network.load_state_dict(online_network.state_dict()) — a copy.
    target_params = tuple(jnp.array(p) for p in online_params)
    predictor_params = init_mlp_params(k_pred, D_OUT, D_HID, D_OUT)

    x1 = jax.random.normal(k_x1, (B, D_IN), jnp.float32)
    x2 = jax.random.normal(k_x2, (B, D_IN), jnp.float32)

    (z1, z2, p1, p2), new_target_params = byol_forward_jit(
        online_params, target_params, predictor_params, x1, x2,
        jnp.float32(EMA_DECAY),
    )
    loss = byol_compute_loss(z1, z2, p1, p2)
    jax.block_until_ready((z1, z2, p1, p2, new_target_params, loss))

    # Sanity check against a plain-JAX reference of the same MLP heads.
    def ref_mlp(x, w1, b1, w2, b2):
        h = jnp.maximum(x @ w1 + b1, 0.0)
        return h @ w2 + b2

    z1_ref = ref_mlp(x1, *online_params)
    z2_ref = ref_mlp(x2, *target_params)
    p1_ref = ref_mlp(z1_ref, *predictor_params)
    p2_ref = ref_mlp(z2_ref, *predictor_params)
    assert jnp.allclose(z1, z1_ref, atol=1e-4, rtol=1e-4)
    assert jnp.allclose(z2, z2_ref, atol=1e-4, rtol=1e-4)
    assert jnp.allclose(p1, p1_ref, atol=1e-4, rtol=1e-4)
    assert jnp.allclose(p2, p2_ref, atol=1e-4, rtol=1e-4)
    # EMA with target == online keeps params (numerically) identical.
    for t_new, o, t_old in zip(new_target_params, online_params, target_params):
        ema_ref = EMA_DECAY * t_old + (1.0 - EMA_DECAY) * o
        assert jnp.allclose(t_new, ema_ref, atol=1e-6)
        assert jnp.allclose(t_new, o, atol=1e-6)

    print("KERNEL_OK")
</pallas_src>

<mosaic_0001>
module attributes {stable_mosaic.version = 11 : i64} {
  func.func @byol_fused_kernel(%arg0: memref<8x128xf32, #tpu.memory_space<vmem>>, %arg1: memref<8x128xf32, #tpu.memory_space<vmem>>, %arg2: memref<128x128xf32, #tpu.memory_space<vmem>>, %arg3: memref<1x128xf32, #tpu.memory_space<vmem>>, %arg4: memref<128x128xf32, #tpu.memory_space<vmem>>, %arg5: memref<1x128xf32, #tpu.memory_space<vmem>>, %arg6: memref<128x128xf32, #tpu.memory_space<vmem>>, %arg7: memref<1x128xf32, #tpu.memory_space<vmem>>, %arg8: memref<128x128xf32, #tpu.memory_space<vmem>>, %arg9: memref<1x128xf32, #tpu.memory_space<vmem>>, %arg10: memref<128x128xf32, #tpu.memory_space<vmem>>, %arg11: memref<1x128xf32, #tpu.memory_space<vmem>>, %arg12: memref<128x128xf32, #tpu.memory_space<vmem>>, %arg13: memref<1x128xf32, #tpu.memory_space<vmem>>, %arg14: memref<8x128xf32, #tpu.memory_space<vmem>>, %arg15: memref<8x128xf32, #tpu.memory_space<vmem>>, %arg16: memref<8x128xf32, #tpu.memory_space<vmem>>, %arg17: memref<8x128xf32, #tpu.memory_space<vmem>>) attributes {dimension_semantics = [], scalar_prefetch = 0 : i64, scratch_operands = 0 : i64, tpu.core_type = #tpu.core_type<tc>} {
    %c0 = arith.constant 0 : index
    %c0_0 = arith.constant 0 : index
    %0 = vector.load %arg0[%c0, %c0_0] : memref<8x128xf32, #tpu.memory_space<vmem>>, vector<8x128xf32>
    %c0_1 = arith.constant 0 : index
    %c0_2 = arith.constant 0 : index
    %1 = vector.load %arg2[%c0_1, %c0_2] : memref<128x128xf32, #tpu.memory_space<vmem>>, vector<128x128xf32>
    %cst = arith.constant dense<0.000000e+00> : vector<8x128xf32>
    %2 = tpu.matmul %0, %1, %cst {dimension_numbers = #tpu.dot_dimension_numbers<[1], [0], [0], [1], [0, 0, 1, 1], [], []>} : vector<8x128xf32>, vector<128x128xf32>, vector<8x128xf32> -> vector<8x128xf32>
    %c0_3 = arith.constant 0 : index
    %c0_4 = arith.constant 0 : index
    %3 = vector.load %arg3[%c0_3, %c0_4] : memref<1x128xf32, #tpu.memory_space<vmem>>, vector<1x128xf32>
    %4 = vector.broadcast %3 : vector<1x128xf32> to vector<8x128xf32>
    %5 = arith.addf %2, %4 : vector<8x128xf32>
    %cst_5 = arith.constant 0.000000e+00 : f32
    %6 = vector.broadcast %cst_5 : f32 to vector<8x128xf32>
    %7 = arith.maximumf %5, %6 : vector<8x128xf32>
    %c0_6 = arith.constant 0 : index
    %c0_7 = arith.constant 0 : index
    %8 = vector.load %arg4[%c0_6, %c0_7] : memref<128x128xf32, #tpu.memory_space<vmem>>, vector<128x128xf32>
    %cst_8 = arith.constant dense<0.000000e+00> : vector<8x128xf32>
    %9 = tpu.matmul %7, %8, %cst_8 {dimension_numbers = #tpu.dot_dimension_numbers<[1], [0], [0], [1], [0, 0, 1, 1], [], []>} : vector<8x128xf32>, vector<128x128xf32>, vector<8x128xf32> -> vector<8x128xf32>
    %c0_9 = arith.constant 0 : index
    %c0_10 = arith.constant 0 : index
    %10 = vector.load %arg5[%c0_9, %c0_10] : memref<1x128xf32, #tpu.memory_space<vmem>>, vector<1x128xf32>
    %11 = vector.broadcast %10 : vector<1x128xf32> to vector<8x128xf32>
    %12 = arith.addf %9, %11 : vector<8x128xf32>
    %c0_11 = arith.constant 0 : index
    %c0_12 = arith.constant 0 : index
    %13 = vector.load %arg1[%c0_11, %c0_12] : memref<8x128xf32, #tpu.memory_space<vmem>>, vector<8x128xf32>
    %c0_13 = arith.constant 0 : index
    %c0_14 = arith.constant 0 : index
    %14 = vector.load %arg6[%c0_13, %c0_14] : memref<128x128xf32, #tpu.memory_space<vmem>>, vector<128x128xf32>
    %cst_15 = arith.constant dense<0.000000e+00> : vector<8x128xf32>
    %15 = tpu.matmul %13, %14, %cst_15 {dimension_numbers = #tpu.dot_dimension_numbers<[1], [0], [0], [1], [0, 0, 1, 1], [], []>} : vector<8x128xf32>, vector<128x128xf32>, vector<8x128xf32> -> vector<8x128xf32>
    %c0_16 = arith.constant 0 : index
    %c0_17 = arith.constant 0 : index
    %16 = vector.load %arg7[%c0_16, %c0_17] : memref<1x128xf32, #tpu.memory_space<vmem>>, vector<1x128xf32>
    %17 = vector.broadcast %16 : vector<1x128xf32> to vector<8x128xf32>
    %18 = arith.addf %15, %17 : vector<8x128xf32>
    %cst_18 = arith.constant 0.000000e+00 : f32
    %19 = vector.broadcast %cst_18 : f32 to vector<8x128xf32>
    %20 = arith.maximumf %18, %19 : vector<8x128xf32>
    %c0_19 = arith.constant 0 : index
    %c0_20 = arith.constant 0 : index
    %21 = vector.load %arg8[%c0_19, %c0_20] : memref<128x128xf32, #tpu.memory_space<vmem>>, vector<128x128xf32>
    %cst_21 = arith.constant dense<0.000000e+00> : vector<8x128xf32>
    %22 = tpu.matmul %20, %21, %cst_21 {dimension_numbers = #tpu.dot_dimension_numbers<[1], [0], [0], [1], [0, 0, 1, 1], [], []>} : vector<8x128xf32>, vector<128x128xf32>, vector<8x128xf32> -> vector<8x128xf32>
    %c0_22 = arith.constant 0 : index
    %c0_23 = arith.constant 0 : index
    %23 = vector.load %arg9[%c0_22, %c0_23] : memref<1x128xf32, #tpu.memory_space<vmem>>, vector<1x128xf32>
    %24 = vector.broadcast %23 : vector<1x128xf32> to vector<8x128xf32>
    %25 = arith.addf %22, %24 : vector<8x128xf32>
    %c0_24 = arith.constant 0 : index
    %c0_25 = arith.constant 0 : index
    %26 = vector.load %arg14[%c0_24, %c0_25] : memref<8x128xf32, #tpu.memory_space<vmem>>, vector<8x128xf32>
    tpu.vector_store %arg14[%c0_24, %c0_25], %12 {strides = array<i32>} : memref<8x128xf32, #tpu.memory_space<vmem>>, vector<8x128xf32>,
    %c0_26 = arith.constant 0 : index
    %c0_27 = arith.constant 0 : index
    %27 = vector.load %arg15[%c0_26, %c0_27] : memref<8x128xf32, #tpu.memory_space<vmem>>, vector<8x128xf32>
    tpu.vector_store %arg15[%c0_26, %c0_27], %25 {strides = array<i32>} : memref<8x128xf32, #tpu.memory_space<vmem>>, vector<8x128xf32>,
    %28 = tpu.concatenate %12, %25 in 0 : vector<8x128xf32>, vector<8x128xf32> -> vector<16x128xf32>
    %c0_28 = arith.constant 0 : index
    %c0_29 = arith.constant 0 : index
    %29 = vector.load %arg10[%c0_28, %c0_29] : memref<128x128xf32, #tpu.memory_space<vmem>>, vector<128x128xf32>
    %cst_30 = arith.constant dense<0.000000e+00> : vector<16x128xf32>
    %30 = tpu.matmul %28, %29, %cst_30 {dimension_numbers = #tpu.dot_dimension_numbers<[1], [0], [0], [1], [0, 0, 1, 1], [], []>} : vector<16x128xf32>, vector<128x128xf32>, vector<16x128xf32> -> vector<16x128xf32>
    %c0_31 = arith.constant 0 : index
    %c0_32 = arith.constant 0 : index
    %31 = vector.load %arg11[%c0_31, %c0_32] : memref<1x128xf32, #tpu.memory_space<vmem>>, vector<1x128xf32>
    %32 = vector.broadcast %31 : vector<1x128xf32> to vector<16x128xf32>
    %33 = arith.addf %30, %32 : vector<16x128xf32>
    %cst_33 = arith.constant 0.000000e+00 : f32
    %34 = vector.broadcast %cst_33 : f32 to vector<16x128xf32>
    %35 = arith.maximumf %33, %34 : vector<16x128xf32>
    %c0_34 = arith.constant 0 : index
    %c0_35 = arith.constant 0 : index
    %36 = vector.load %arg12[%c0_34, %c0_35] : memref<128x128xf32, #tpu.memory_space<vmem>>, vector<128x128xf32>
    %cst_36 = arith.constant dense<0.000000e+00> : vector<16x128xf32>
    %37 = tpu.matmul %35, %36, %cst_36 {dimension_numbers = #tpu.dot_dimension_numbers<[1], [0], [0], [1], [0, 0, 1, 1], [], []>} : vector<16x128xf32>, vector<128x128xf32>, vector<16x128xf32> -> vector<16x128xf32>
    %c0_37 = arith.constant 0 : index
    %c0_38 = arith.constant 0 : index
    %38 = vector.load %arg13[%c0_37, %c0_38] : memref<1x128xf32, #tpu.memory_space<vmem>>, vector<1x128xf32>
    %39 = vector.broadcast %38 : vector<1x128xf32> to vector<16x128xf32>
    %40 = arith.addf %37, %39 : vector<16x128xf32>
    %41 = vector.extract_strided_slice %40 {offsets = [0, 0], sizes = [8, 128], strides = [1, 1]} : vector<16x128xf32> to vector<8x128xf32>
    %c0_39 = arith.constant 0 : index
    %c0_40 = arith.constant 0 : index
    %42 = vector.load %arg16[%c0_39, %c0_40] : memref<8x128xf32, #tpu.memory_space<vmem>>, vector<8x128xf32>
    tpu.vector_store %arg16[%c0_39, %c0_40], %41 {strides = array<i32>} : memref<8x128xf32, #tpu.memory_space<vmem>>, vector<8x128xf32>,
    %43 = vector.extract_strided_slice %40 {offsets = [8, 0], sizes = [8, 128], strides = [1, 1]} : vector<16x128xf32> to vector<8x128xf32>
    %c0_41 = arith.constant 0 : index
    %c0_42 = arith.constant 0 : index
    %44 = vector.load %arg17[%c0_41, %c0_42] : memref<8x128xf32, #tpu.memory_space<vmem>>, vector<8x128xf32>
    tpu.vector_store %arg17[%c0_41, %c0_42], %43 {strides = array<i32>} : memref<8x128xf32, #tpu.memory_space<vmem>>, vector<8x128xf32>,
    return
  }
}

module attributes {stable_mosaic.version = 11 : i64} {
  func.func @ema_fused_kernel(%arg0: memref<1xf32, #tpu.memory_space<smem>>, %arg1: memref<128x128xf32, #tpu.memory_space<vmem>>, %arg2: memref<1x128xf32, #tpu.memory_space<vmem>>, %arg3: memref<128x128xf32, #tpu.memory_space<vmem>>, %arg4: memref<1x128xf32, #tpu.memory_space<vmem>>, %arg5: memref<128x128xf32, #tpu.memory_space<vmem>>, %arg6: memref<1x128xf32, #tpu.memory_space<vmem>>, %arg7: memref<128x128xf32, #tpu.memory_space<vmem>>, %arg8: memref<1x128xf32, #tpu.memory_space<vmem>>, %arg9: memref<128x128xf32, #tpu.memory_space<vmem>>, %arg10: memref<1x128xf32, #tpu.memory_space<vmem>>, %arg11: memref<128x128xf32, #tpu.memory_space<vmem>>, %arg12: memref<1x128xf32, #tpu.memory_space<vmem>>) attributes {dimension_semantics = [], scalar_prefetch = 0 : i64, scratch_operands = 0 : i64, tpu.core_type = #tpu.core_type<tc>} {
    %c0 = arith.constant 0 : index
    %0 = memref.load %arg0[%c0] : memref<1xf32, #tpu.memory_space<smem>>
    %cst = arith.constant 1.000000e+00 : f32
    %1 = arith.subf %cst, %0 : f32
    %c0_0 = arith.constant 0 : index
    %c0_1 = arith.constant 0 : index
    %2 = vector.load %arg1[%c0_0, %c0_1] : memref<128x128xf32, #tpu.memory_space<vmem>>, vector<128x128xf32>
    %3 = vector.broadcast %0 : f32 to vector<128x128xf32>
    %4 = arith.mulf %3, %2 : vector<128x128xf32>
    %c0_2 = arith.constant 0 : index
    %c0_3 = arith.constant 0 : index
    %5 = vector.load %arg5[%c0_2, %c0_3] : memref<128x128xf32, #tpu.memory_space<vmem>>, vector<128x128xf32>
    %6 = vector.broadcast %1 : f32 to vector<128x128xf32>
    %7 = arith.mulf %6, %5 : vector<128x128xf32>
    %8 = arith.addf %4, %7 : vector<128x128xf32>
    %c0_4 = arith.constant 0 : index
    %c0_5 = arith.constant 0 : index
    %9 = vector.load %arg9[%c0_4, %c0_5] : memref<128x128xf32, #tpu.memory_space<vmem>>, vector<128x128xf32>
    tpu.vector_store %arg9[%c0_4, %c0_5], %8 {strides = array<i32>} : memref<128x128xf32, #tpu.memory_space<vmem>>, vector<128x128xf32>,
    %c0_6 = arith.constant 0 : index
    %c0_7 = arith.constant 0 : index
    %10 = vector.load %arg2[%c0_6, %c0_7] : memref<1x128xf32, #tpu.memory_space<vmem>>, vector<1x128xf32>
    %11 = vector.broadcast %0 : f32 to vector<1x128xf32>
    %12 = arith.mulf %11, %10 : vector<1x128xf32>
    %c0_8 = arith.constant 0 : index
    %c0_9 = arith.constant 0 : index
    %13 = vector.load %arg6[%c0_8, %c0_9] : memref<1x128xf32, #tpu.memory_space<vmem>>, vector<1x128xf32>
    %14 = vector.broadcast %1 : f32 to vector<1x128xf32>
    %15 = arith.mulf %14, %13 : vector<1x128xf32>
    %16 = arith.addf %12, %15 : vector<1x128xf32>
    %c0_10 = arith.constant 0 : index
    %c0_11 = arith.constant 0 : index
    %17 = vector.load %arg10[%c0_10, %c0_11] : memref<1x128xf32, #tpu.memory_space<vmem>>, vector<1x128xf32>
    tpu.vector_store %arg10[%c0_10, %c0_11], %16 {strides = array<i32>} : memref<1x128xf32, #tpu.memory_space<vmem>>, vector<1x128xf32>,
    %c0_12 = arith.constant 0 : index
    %c0_13 = arith.constant 0 : index
    %18 = vector.load %arg3[%c0_12, %c0_13] : memref<128x128xf32, #tpu.memory_space<vmem>>, vector<128x128xf32>
    %19 = vector.broadcast %0 : f32 to vector<128x128xf32>
    %20 = arith.mulf %19, %18 : vector<128x128xf32>
    %c0_14 = arith.constant 0 : index
    %c0_15 = arith.constant 0 : index
    %21 = vector.load %arg7[%c0_14, %c0_15] : memref<128x128xf32, #tpu.memory_space<vmem>>, vector<128x128xf32>
    %22 = vector.broadcast %1 : f32 to vector<128x128xf32>
    %23 = arith.mulf %22, %21 : vector<128x128xf32>
    %24 = arith.addf %20, %23 : vector<128x128xf32>
    %c0_16 = arith.constant 0 : index
    %c0_17 = arith.constant 0 : index
    %25 = vector.load %arg11[%c0_16, %c0_17] : memref<128x128xf32, #tpu.memory_space<vmem>>, vector<128x128xf32>
    tpu.vector_store %arg11[%c0_16, %c0_17], %24 {strides = array<i32>} : memref<128x128xf32, #tpu.memory_space<vmem>>, vector<128x128xf32>,
    %c0_18 = arith.constant 0 : index
    %c0_19 = arith.constant 0 : index
    %26 = vector.load %arg4[%c0_18, %c0_19] : memref<1x128xf32, #tpu.memory_space<vmem>>, vector<1x128xf32>
    %27 = vector.broadcast %0 : f32 to vector<1x128xf32>
    %28 = arith.mulf %27, %26 : vector<1x128xf32>
    %c0_20 = arith.constant 0 : index
    %c0_21 = arith.constant 0 : index
    %29 = vector.load %arg8[%c0_20, %c0_21] : memref<1x128xf32, #tpu.memory_space<vmem>>, vector<1x128xf32>
    %30 = vector.broadcast %1 : f32 to vector<1x128xf32>
    %31 = arith.mulf %30, %29 : vector<1x128xf32>
    %32 = arith.addf %28, %31 : vector<1x128xf32>
    %c0_22 = arith.constant 0 : index
    %c0_23 = arith.constant 0 : index
    %33 = vector.load %arg12[%c0_22, %c0_23] : memref<1x128xf32, #tpu.memory_space<vmem>>, vector<1x128xf32>
    tpu.vector_store %arg12[%c0_22, %c0_23], %32 {strides = array<i32>} : memref<1x128xf32, #tpu.memory_space<vmem>>, vector<1x128xf32>,
    return
  }
}

</mosaic_0001>

<bundles_post_ra>
// kernel: byol_forward.3
= control target key start
LH: loop header
LB: loop body
LE: loop exit
PB: predicated region body
PF: predicated region fallthrough
CT: control target
= control target key end

     0   :  { %s710_s0 = inlined_call_operand.<no memory space> [shape: f32[1], index: 0, kind: input, shape index: {}]   ;;  %s711_s1 = inlined_call_operand.vmem [shape: f32[128,128], index: 1, kind: input, shape index: {}, may-alias: {1,9}]   ;;  %s712_s5 = inlined_call_operand.vmem [shape: f32[128,128], index: 5, kind: input, shape index: {}]   ;;  %s713_s9 = inlined_call_operand.vmem [shape: f32[128,128], index: 9, kind: output, shape index: {0}, may-alias: {1,9}]   ;;  %s714_s2 = inlined_call_operand.vmem [shape: f32[1,128], index: 2, kind: input, shape index: {}, may-alias: {2,10}]   ;;  %s715_s6 = inlined_call_operand.vmem [shape: f32[1,128], index: 6, kind: input, shape index: {}]   ;;  %s716_s3 = inlined_call_operand.vmem [shape: f32[128,128], index: 3, kind: input, shape index: {}, may-alias: {3,11}]   ;;  %s717_s7 = inlined_call_operand.vmem [shape: f32[128,128], index: 7, kind: input, shape index: {}]   ;;  %s718_s10 = inlined_call_operand.vmem [shape: f32[1,128], index: 10, kind: output, shape index: {1}, may-alias: {2,10}]   ;;  %s719_s11 = inlined_call_operand.vmem [shape: f32[128,128], index: 11, kind: output, shape index: {2}, may-alias: {3,11}]   ;;  %s720_s4 = inlined_call_operand.vmem [shape: f32[1,128], index: 4, kind: input, shape index: {}, may-alias: {4,12}]   ;;  %s721_s8 = inlined_call_operand.vmem [shape: f32[1,128], index: 8, kind: input, shape index: {}]   ;;  %s722_s12 = inlined_call_operand.vmem [shape: f32[1,128], index: 12, kind: output, shape index: {3}, may-alias: {4,12}]  }
   0x1   :  { %s38_s23 = ssub.f32 1.0, %s710_s0  ;;  %v39_v0 = vld [vmem:[%s711_s1] sm:$0xff]  ;;  %v335_v1 = vstv %s710_s0  ;;  %v40_v3 = vld [vmem:[%s711_s1 + $0x8] sm:$0xff]  ;;  %v41_v7 = vld [vmem:[%s711_s1 + $0x10] sm:$0xff] }
   0x2   :  { %v72_v2 = vld [vmem:[%s712_s5] sm:$0xff]  ;;  %v56_v4 = vmul.f32 %v335_v1, %v39_v0  ;;  %v57_v5 = vmul.f32 %v335_v1, %v40_v3  ;;  %v73_v6 = vld [vmem:[%s712_s5 + $0x8] sm:$0xff]  ;;  %v74_v8 = vld [vmem:[%s712_s5 + $0x10] sm:$0xff]  ;;  %v58_v10 = vmul.f32 %v335_v1, %v41_v7 }
   0x3   :  { %v354_v9 = vstv %s38_s23  ;;  %v42_v11 = vld [vmem:[%s711_s1 + $0x18] sm:$0xff]  ;;  %v43_v13 = vld [vmem:[%s711_s1 + $0x20] sm:$0xff]  ;;  %v44_v19 = vld [vmem:[%s711_s1 + $0x28] sm:$0xff] }
   0x4   :  { %v75_v12 = vld [vmem:[%s712_s5 + $0x18] sm:$0xff]  ;;  %v89_v14 = vmul.f32 %v354_v9, %v72_v2  ;;  %v90_v15 = vmul.f32 %v354_v9, %v73_v6  ;;  %v91_v16 = vmul.f32 %v354_v9, %v74_v8  ;;  %v59_v17 = vmul.f32 %v335_v1, %v42_v11  ;;  %v76_v18 = vld [vmem:[%s712_s5 + $0x20] sm:$0xff]  ;;  %v77_v20 = vld [vmem:[%s712_s5 + $0x28] sm:$0xff] }
   0x5   :  { %v92_v21 = vmul.f32 %v354_v9, %v75_v12  ;;  %v60_v22 = vmul.f32 %v335_v1, %v43_v13  ;;  %v93_v23 = vmul.f32 %v354_v9, %v76_v18  ;;  %v61_v24 = vmul.f32 %v335_v1, %v44_v19  ;;  %v45_v25 = vld [vmem:[%s711_s1 + $0x30] sm:$0xff]  ;;  %v46_v27 = vld [vmem:[%s711_s1 + $0x38] sm:$0xff]  ;;  %v47_v33 = vld [vmem:[%s711_s1 + $0x40] sm:$0xff] }
   0x6   :  { %v78_v26 = vld [vmem:[%s712_s5 + $0x30] sm:$0xff]  ;;  %v105_v28 = vadd.f32 %v89_v14, %v56_v4  ;;  %v106_v29 = vadd.f32 %v90_v15, %v57_v5  ;;  %v107_v30 = vadd.f32 %v91_v16, %v58_v10  ;;  %v94_v31 = vmul.f32 %v354_v9, %v77_v20  ;;  %v79_v32 = vld [vmem:[%s712_s5 + $0x38] sm:$0xff]  ;;  %v80_v34 = vld [vmem:[%s712_s5 + $0x40] sm:$0xff] }
   0x7   :  { %v108_v35 = vadd.f32 %v92_v21, %v59_v17  ;;  %v109_v36 = vadd.f32 %v93_v23, %v60_v22  ;;  %v62_v37 = vmul.f32 %v335_v1, %v45_v25  ;;  %v95_v38 = vmul.f32 %v354_v9, %v78_v26  ;;  %v48_v39 = vld [vmem:[%s711_s1 + $0x48] sm:$0xff]  ;;  %v49_v41 = vld [vmem:[%s711_s1 + $0x50] sm:$0xff]  ;;  %v83_v48 = vld [vmem:[%s712_s5 + $0x58] sm:$0xff] }
   0x8   :  { %v81_v40 = vld [vmem:[%s712_s5 + $0x48] sm:$0xff]  ;;  %121 = vst [vmem:[%s713_s9] sm:$0xff] %v105_v28  ;;  %122 = vst [vmem:[%s713_s9 + $0x8] sm:$0xff] %v106_v29  ;;  %v110_v42 = vadd.f32 %v94_v31, %v61_v24  ;;  %v63_v43 = vmul.f32 %v335_v1, %v46_v27  ;;  %v96_v44 = vmul.f32 %v354_v9, %v79_v32  ;;  %v82_v46 = vld [vmem:[%s712_s5 + $0x50] sm:$0xff] }
   0x9   :  { %123 = vst [vmem:[%s713_s9 + $0x10] sm:$0xff] %v107_v30  ;;  %v64_v45 = vmul.f32 %v335_v1, %v47_v33  ;;  %v111_v49 = vadd.f32 %v95_v38, %v62_v37  ;;  %v97_v50 = vmul.f32 %v354_v9, %v80_v34  ;;  %v65_v51 = vmul.f32 %v335_v1, %v48_v39  ;;  %v84_v54 = vld [vmem:[%s712_s5 + $0x60] sm:$0xff]  ;;  %v85_v60 = vld [vmem:[%s712_s5 + $0x68] sm:$0xff]  ;;  %v86_v62 = vld [vmem:[%s712_s5 + $0x70] sm:$0xff] }
   0xa   :  { %v98_v52 = vmul.f32 %v354_v9, %v81_v40  ;;  %v112_v56 = vadd.f32 %v96_v44, %v63_v43  ;;  %v66_v57 = vmul.f32 %v335_v1, %v49_v41  ;;  %v99_v58 = vmul.f32 %v354_v9, %v82_v46  ;;  %v87_v5 = vld [vmem:[%s712_s5 + $0x78] sm:$0xff]  ;;  %v137_v6 = vld [vmem:[%s714_s2] sm:$0x1]  ;;  %v144_v19 = vld [vmem:[%s716_s3 + $0x8] sm:$0xff] }
   0xb   :  { %v113_v63 = vadd.f32 %v97_v50, %v64_v45  ;;  %v100_v2 = vmul.f32 %v354_v9, %v83_v48  ;;  %v101_v8 = vmul.f32 %v354_v9, %v84_v54  ;;  %v102_v11 = vmul.f32 %v354_v9, %v85_v60  ;;  %v139_v12 = vld [vmem:[%s715_s6] sm:$0x1]  ;;  %v176_v20 = vld [vmem:[%s717_s7 + $0x8] sm:$0xff]  ;;  %v145_v21 = vld [vmem:[%s716_s3 + $0x10] sm:$0xff] }
   0xc   :  { %v114_v0 = vadd.f32 %v98_v52, %v65_v51  ;;  %v115_v7 = vadd.f32 %v99_v58, %v66_v57  ;;  %v143_v13 = vld [vmem:[%s716_s3] sm:$0xff]  ;;  %v103_v17 = vmul.f32 %v354_v9, %v86_v62  ;;  %v104_v24 = vmul.f32 %v354_v9, %v87_v5  ;;  %v177_v26 = vld [vmem:[%s717_s7 + $0x10] sm:$0xff]  ;;  %v146_v27 = vld [vmem:[%s716_s3 + $0x18] sm:$0xff] }
   0xd   :  { %v175_v14 = vld [vmem:[%s717_s7] sm:$0xff]  ;;  %v138_v25 = vmul.f32 %v137_v6, %v335_v1  ;;  %v140_v29 = vmul.f32 %v139_v12, %v354_v9  ;;  %v159_v30 = vmul.f32 %v143_v13, %v335_v1  ;;  %v178_v32 = vld [vmem:[%s717_s7 + $0x18] sm:$0xff]  ;;  %v192_v37 = vmul.f32 %v176_v20, %v354_v9  ;;  %v148_v39 = vld [vmem:[%s716_s3 + $0x28] sm:$0xff] }
   0xe   :  { %v191_v31 = vmul.f32 %v175_v14, %v354_v9  ;;  %v147_v33 = vld [vmem:[%s716_s3 + $0x20] sm:$0xff]  ;;  %v161_v38 = vmul.f32 %v145_v21, %v335_v1  ;;  %v180_v40 = vld [vmem:[%s717_s7 + $0x28] sm:$0xff]  ;;  %v149_v41 = vld [vmem:[%s716_s3 + $0x30] sm:$0xff]  ;;  %v193_v44 = vmul.f32 %v177_v26, %v354_v9  ;;  %v162_v45 = vmul.f32 %v146_v27, %v335_v1 }
   0xf   :  { %v179_v34 = vld [vmem:[%s717_s7 + $0x20] sm:$0xff]  ;;  %v181_v46 = vld [vmem:[%s717_s7 + $0x30] sm:$0xff]  ;;  %v163_v50 = vmul.f32 %v147_v33, %v335_v1  ;;  %v182_v52 = vld [vmem:[%s717_s7 + $0x38] sm:$0xff]  ;;  %v196_v57 = vmul.f32 %v180_v40, %v354_v9  ;;  %v165_v58 = vmul.f32 %v149_v41, %v335_v1 }
  0x10   :  { %v50_v47 = vld [vmem:[%s711_s1 + $0x58] sm:$0xff]  ;;  %v207_v43 = vadd.f32 %v191_v31, %v159_v30  ;;  %v195_v51 = vmul.f32 %v179_v34, %v354_v9  ;;  %v183_v54 = vld [vmem:[%s717_s7 + $0x40] sm:$0xff]  ;;  %v184_v60 = vld [vmem:[%s717_s7 + $0x48] sm:$0xff]  ;;  %v198_v6 = vmul.f32 %v182_v52, %v354_v9 }
  0x11   :  { %124 = vst [vmem:[%s713_s9 + $0x18] sm:$0xff] %v108_v35  ;;  %125 = vst [vmem:[%s713_s9 + $0x20] sm:$0xff] %v109_v36  ;;  %v67_v59 = vmul.f32 %v335_v1, %v50_v47  ;;  %v160_v36 = vmul.f32 %v144_v19, %v335_v1  ;;  %v150_v47 = vld [vmem:[%s716_s3 + $0x38] sm:$0xff]  ;;  %v187_v12 = vld [vmem:[%s717_s7 + $0x60] sm:$0xff] }
  0x12   :  { %v190_v30 = vld [vmem:[%s717_s7 + $0x78] sm:$0xff]  ;;  %v239_v31 = vld [vmem:[%s720_s4] sm:$0x1] }
  0x13   :  { %v116_v15 = vadd.f32 %v100_v2, %v67_v59  ;;  %v208_v48 = vadd.f32 %v192_v37, %v160_v36  ;;  %v166_v2 = vmul.f32 %v150_v47, %v335_v1 }
  0x15   :  { %v214_v20 = vadd.f32 %v198_v6, %v166_v2 }
  0x18   :  { %v51_v53 = vld [vmem:[%s711_s1 + $0x60] sm:$0xff]  ;;  %v52_v55 = vld [vmem:[%s711_s1 + $0x68] sm:$0xff] }
  0x19   :  { %126 = vst [vmem:[%s713_s9 + $0x28] sm:$0xff] %v110_v42  ;;  %v68_v3 = vmul.f32 %v335_v1, %v51_v53  ;;  %v69_v10 = vmul.f32 %v335_v1, %v52_v55  ;;  %v141_v42 = vadd.f32 %v140_v29, %v138_v25  ;;  %v151_v53 = vld [vmem:[%s716_s3 + $0x40] sm:$0xff]  ;;  %v209_v55 = vadd.f32 %v193_v44, %v161_v38 }
  0x1a   :  { %223 = vst [vmem:[%s719_s11] sm:$0xff] %v207_v43  ;;  %v203_v29 = vmul.f32 %v187_v12, %v354_v9  ;;  %v240_v43 = vmul.f32 %v239_v31, %v335_v1 }
  0x1b   :  { %v117_v22 = vadd.f32 %v101_v8, %v68_v3  ;;  %v118_v23 = vadd.f32 %v102_v11, %v69_v10  ;;  %142 = vst [vmem:[%s718_s10] sm:$0x1] %v141_v42  ;;  %v185_v3 = vld [vmem:[%s717_s7 + $0x50] sm:$0xff]  ;;  %v199_v8 = vmul.f32 %v183_v54, %v354_v9  ;;  %v186_v10 = vld [vmem:[%s717_s7 + $0x58] sm:$0xff]  ;;  %v206_v42 = vmul.f32 %v190_v30, %v354_v9 }
  0x1c   :  { %v202_v27 = vmul.f32 %v186_v10, %v354_v9 }
  0x20   :  { %v53_v61 = vld [vmem:[%s711_s1 + $0x70] sm:$0xff] }
  0x21   :  { %127 = vst [vmem:[%s713_s9 + $0x30] sm:$0xff] %v111_v49  ;;  %v70_v16 = vmul.f32 %v335_v1, %v53_v61  ;;  %v194_v49 = vmul.f32 %v178_v32, %v354_v9  ;;  %v152_v59 = vld [vmem:[%s716_s3 + $0x48] sm:$0xff]  ;;  %v153_v61 = vld [vmem:[%s716_s3 + $0x50] sm:$0xff]  ;;  %v241_v32 = vld [vmem:[%s721_s8] sm:$0x1] }
  0x22   :  { %224 = vst [vmem:[%s719_s11 + $0x8] sm:$0xff] %v208_v48  ;;  %v168_v14 = vmul.f32 %v152_v59, %v335_v1  ;;  %v242_v44 = vmul.f32 %v241_v32, %v354_v9 }
  0x23   :  { %v119_v28 = vadd.f32 %v103_v17, %v70_v16  ;;  %v210_v62 = vadd.f32 %v194_v49, %v162_v45  ;;  %v169_v16 = vmul.f32 %v153_v61, %v335_v1 }
  0x24   :  { %v243_v47 = vadd.f32 %v242_v44, %v240_v43 }
  0x26   :  { %244 = vst [vmem:[%s722_s12] sm:$0x1] %v243_v47 }
  0x28   :  { %v54_v4 = vld [vmem:[%s711_s1 + $0x78] sm:$0xff] }
  0x29   :  { %128 = vst [vmem:[%s713_s9 + $0x38] sm:$0xff] %v112_v56  ;;  %129 = vst [vmem:[%s713_s9 + $0x40] sm:$0xff] %v113_v63  ;;  %v71_v18 = vmul.f32 %v335_v1, %v54_v4  ;;  %v164_v56 = vmul.f32 %v148_v39, %v335_v1  ;;  %v211_v63 = vadd.f32 %v195_v51, %v163_v50  ;;  %v154_v4 = vld [vmem:[%s716_s3 + $0x58] sm:$0xff] }
  0x2a   :  { %130 = vst [vmem:[%s713_s9 + $0x48] sm:$0xff] %v114_v0  ;;  %131 = vst [vmem:[%s713_s9 + $0x50] sm:$0xff] %v115_v7  ;;  %v197_v0 = vmul.f32 %v181_v46, %v354_v9  ;;  %v167_v7 = vmul.f32 %v151_v53, %v335_v1 }
  0x2b   :  { %132 = vst [vmem:[%s713_s9 + $0x58] sm:$0xff] %v116_v15  ;;  %133 = vst [vmem:[%s713_s9 + $0x60] sm:$0xff] %v117_v22  ;;  %v120_v35 = vadd.f32 %v104_v24, %v71_v18  ;;  %v212_v5 = vadd.f32 %v196_v57, %v164_v56  ;;  %v200_v15 = vmul.f32 %v184_v60, %v354_v9  ;;  %v188_v18 = vld [vmem:[%s717_s7 + $0x68] sm:$0xff]  ;;  %v189_v24 = vld [vmem:[%s717_s7 + $0x70] sm:$0xff] }
  0x2c   :  { %134 = vst [vmem:[%s713_s9 + $0x68] sm:$0xff] %v118_v23  ;;  %135 = vst [vmem:[%s713_s9 + $0x70] sm:$0xff] %v119_v28  ;;  %v213_v13 = vadd.f32 %v197_v0, %v165_v58  ;;  %v215_v21 = vadd.f32 %v199_v8, %v167_v7  ;;  %v201_v22 = vmul.f32 %v185_v3, %v354_v9 }
  0x2d   :  { %136 = vst [vmem:[%s713_s9 + $0x78] sm:$0xff] %v120_v35  ;;  %225 = vst [vmem:[%s719_s11 + $0x10] sm:$0xff] %v209_v55  ;;  %v170_v23 = vmul.f32 %v154_v4, %v335_v1  ;;  %v216_v26 = vadd.f32 %v200_v15, %v168_v14  ;;  %v204_v35 = vmul.f32 %v188_v18, %v354_v9 }
  0x2e   :  { %v217_v33 = vadd.f32 %v201_v22, %v169_v16  ;;  %v205_v39 = vmul.f32 %v189_v24, %v354_v9 }
  0x2f   :  { %v218_v37 = vadd.f32 %v202_v27, %v170_v23 }
  0x34   :  { %v155_v11 = vld [vmem:[%s716_s3 + $0x60] sm:$0xff] }
  0x35   :  { %226 = vst [vmem:[%s719_s11 + $0x18] sm:$0xff] %v210_v62  ;;  %227 = vst [vmem:[%s719_s11 + $0x20] sm:$0xff] %v211_v63  ;;  %v171_v28 = vmul.f32 %v155_v11, %v335_v1 }
  0x37   :  { %v219_v38 = vadd.f32 %v203_v29, %v171_v28 }
  0x3c   :  { %v156_v17 = vld [vmem:[%s716_s3 + $0x68] sm:$0xff]  ;;  %v157_v19 = vld [vmem:[%s716_s3 + $0x70] sm:$0xff] }
  0x3d   :  { %228 = vst [vmem:[%s719_s11 + $0x28] sm:$0xff] %v212_v5  ;;  %v172_v34 = vmul.f32 %v156_v17, %v335_v1  ;;  %v173_v36 = vmul.f32 %v157_v19, %v335_v1 }
  0x3f   :  { %v220_v41 = vadd.f32 %v204_v35, %v172_v34  ;;  %v221_v45 = vadd.f32 %v205_v39, %v173_v36 }
  0x44   :  { %v158_v25 = vld [vmem:[%s716_s3 + $0x78] sm:$0xff] }
  0x45   :  { %229 = vst [vmem:[%s719_s11 + $0x30] sm:$0xff] %v213_v13  ;;  %230 = vst [vmem:[%s719_s11 + $0x38] sm:$0xff] %v214_v20  ;;  %v174_v40 = vmul.f32 %v158_v25, %v335_v1 }
  0x46   :  { %231 = vst [vmem:[%s719_s11 + $0x40] sm:$0xff] %v215_v21  ;;  %232 = vst [vmem:[%s719_s11 + $0x48] sm:$0xff] %v216_v26 }
  0x47   :  { %233 = vst [vmem:[%s719_s11 + $0x50] sm:$0xff] %v217_v33  ;;  %234 = vst [vmem:[%s719_s11 + $0x58] sm:$0xff] %v218_v37  ;;  %v222_v46 = vadd.f32 %v206_v42, %v174_v40 }
  0x48   :  { %235 = vst [vmem:[%s719_s11 + $0x60] sm:$0xff] %v219_v38  ;;  %236 = vst [vmem:[%s719_s11 + $0x68] sm:$0xff] %v220_v41 }
  0x49   :  { %237 = vst [vmem:[%s719_s11 + $0x70] sm:$0xff] %v221_v45  ;;  %238 = vst [vmem:[%s719_s11 + $0x78] sm:$0xff] %v222_v46 }

// kernel: byol_forward.2
= control target key start
LH: loop header
LB: loop body
LE: loop exit
PB: predicated region body
PF: predicated region fallthrough
CT: control target
= control target key end

     0   :  { %s1813_s0 = inlined_call_operand.vmem [shape: f32[8,128], index: 0, kind: input, shape index: {}]   ;;  %s1814_s1 = inlined_call_operand.hbm [shape: f32[8,128], index: 1, kind: input, shape index: {}]   ;;  %s1815_s2 = inlined_call_operand.vmem [shape: f32[128,128], index: 2, kind: input, shape index: {}]   ;;  %s1816_s3 = inlined_call_operand.vmem [shape: f32[1,128], index: 3, kind: input, shape index: {}]   ;;  %s1817_s4 = inlined_call_operand.vmem [shape: f32[128,128], index: 4, kind: input, shape index: {}]   ;;  %s1818_s5 = inlined_call_operand.vmem [shape: f32[1,128], index: 5, kind: input, shape index: {}]   ;;  %s1819_s6 = inlined_call_operand.vmem [shape: f32[128,128], index: 6, kind: input, shape index: {}]   ;;  %s1820_s7 = inlined_call_operand.vmem [shape: f32[1,128], index: 7, kind: input, shape index: {}]   ;;  %s1821_s8 = inlined_call_operand.vmem [shape: f32[128,128], index: 8, kind: input, shape index: {}]   ;;  %s1822_s9 = inlined_call_operand.vmem [shape: f32[1,128], index: 9, kind: input, shape index: {}]   ;;  %s1823_s10 = inlined_call_operand.vmem [shape: f32[128,128], index: 10, kind: input, shape index: {}]   ;;  %s1824_s11 = inlined_call_operand.vmem [shape: f32[1,128], index: 11, kind: input, shape index: {}]   ;;  %s1825_s12 = inlined_call_operand.vmem [shape: f32[128,128], index: 12, kind: input, shape index: {}]   ;;  %s1826_s13 = inlined_call_operand.vmem [shape: f32[1,128], index: 13, kind: input, shape index: {}]   ;;  %s1827_s14 = inlined_call_operand.hbm [shape: f32[8,128], index: 14, kind: output, shape index: {0}]   ;;  %s1828_s15 = inlined_call_operand.hbm [shape: f32[8,128], index: 15, kind: output, shape index: {1}]   ;;  %s1829_s16 = inlined_call_operand.hbm [shape: f32[8,128], index: 16, kind: output, shape index: {2}]   ;;  %s1830_s17 = inlined_call_operand.hbm [shape: f32[8,128], index: 17, kind: output, shape index: {3}]  }
   0x1   :  { %1832 = sst [smem:[#allocation15_spill]] %s1813_s0 }
   0x2   :  { %1833 = sst [smem:[#allocation16_spill]] %s1814_s1 }
   0x3   :  { %23 = vsyncpa [#allocation3], 0 }
   0x4   :  { %24 = vsyncpa [#allocation4], 0 }
   0x5   :  { %25 = vsyncpa [#allocation7], 0 }
   0x6   :  { %26 = vsyncpa [#allocation10], 0  ;;  %s1306_s24 = smov [#allocation2]   ;;  %s1834_s28 = sld [smem:[#allocation16_spill]] }
   0x7   :  { %s35_s25 = sshll.u32 %s1306_s24, 4  ;;  %s36_s25 = int_to_ptr.vmem [resolvable:$true] %s35_s25 }
   0xc   :  { %s1188_s29 = scalar_lea.hbm %s1834_s28, 128 }
   0xd   :  { %p1189_p0 = scmp.ne.s32.totalorder %s1834_s28, %s1188_s29  ;;  %p1192_p1 = scmp.lt.u32.totalorder %s1188_s29, %s1834_s28 }
   0xf   :  { %p1194_p2 = pnand %p1192_p1, %p1189_p0 }
  0x11   :  { %1197 = shalt.err (!%p1194_p2)
}
  0x12   :  { %s1198_s1 = scalar_lea.vmem %s36_s25, 128  ;;  %p1203_p4 = scmp.lt.s32.totalorder %s36_s25, %s36_s25 }
  0x13   :  { %p1199_p3 = scmp.ne.s32.totalorder %s36_s25, %s1198_s1  ;;  %p1204_p5 = scmp.lt.s32.totalorder %s1198_s1, %s1198_s1 }
  0x15   :  { %p1205_p6 = por %p1204_p5, %p1203_p4 }
  0x17   :  { %p1206_p7 = pnand %p1205_p6, %p1199_p3 }
  0x19   :  { %1209 = shalt.err (!%p1206_p7)
}
  0x1a   :  { %38 = dma.hbm_to_vmem [thread:$0]  %s1834_s28, 128, %s36_s25, [#allocation3]  }
  0x1b   :  { %1298 = dma.done.wait [#allocation3], 128  }
  0x1c   :  { %1299 = vsyncadd [#allocation3], 4294967168  ;;  %v1307_v0 = vmov 0.0|0.0   ;;  %vm1308_vm0 = vmmov 0   ;;  %v1309_v1 = vmov 0.0   ;;  %v67_v2 = vld [vmem:[%s1815_s2] sm:$0xff] }
  0x1d   :  { %1020 = vmatprep.subr.bf16.mxu0 %v1307_v0  ;;  %842 = vmatprep.mubr.msk.f32.mxu0 %vm1308_vm0, %v1309_v1  ;;  %v68_v3 = vld [vmem:[%s1815_s2 + $0x8] sm:$0xff]  ;;  %v69_v4 = vld [vmem:[%s1815_s2 + $0x10] sm:$0xff]  ;;  %v70_v6 = vld [vmem:[%s1815_s2 + $0x18] sm:$0xff]  ;;  %s1835_s23 = sld [smem:[#allocation15_spill]]  ;;  %s1311_s28 = smov [#allocation5]  }
  0x1e   :  { %1044 = vmatprep.subr.bf16.mxu1 %v1307_v0  ;;  %877 = vmatprep.mubr.msk.f32.mxu1 %vm1308_vm0, %v1309_v1  ;;  %v1021_v5 = vpack.c.bf16 %v68_v3, %v67_v2  ;;  %v1024_v7 = vpack.c.bf16 %v70_v6, %v69_v4  ;;  %v71_v8 = vld [vmem:[%s1815_s2 + $0x20] sm:$0xff]  ;;  %v72_v9 = vld [vmem:[%s1815_s2 + $0x28] sm:$0xff]  ;;  %v73_v11 = vld [vmem:[%s1815_s2 + $0x30] sm:$0xff] }
  0x1f   :  { %v1027_v10 = vpack.c.bf16 %v72_v9, %v71_v8  ;;  %v74_v12 = vld [vmem:[%s1815_s2 + $0x38] sm:$0xff]  ;;  %v75_v14 = vld [vmem:[%s1815_s2 + $0x40] sm:$0xff]  ;;  %v162_v16 = vld [vmem:[%s1817_s4 + $0x8] sm:$0xff] }
  0x20   :  { %1022 = vmatpush3.bf16.msra.mxu0 %v1021_v5  ;;  %v1030_v13 = vpack.c.bf16 %v74_v12, %v73_v11  ;;  %v161_v15 = vld [vmem:[%s1817_s4] sm:$0xff]  ;;  %v76_v17 = vld [vmem:[%s1815_s2 + $0x48] sm:$0xff]  ;;  %v163_v19 = vld [vmem:[%s1817_s4 + $0x10] sm:$0xff] }
  0x21   :  { %1023 = vmatprep.subr.bf16.mxu0 %v1307_v0  ;;  %v1045_v18 = vpack.c.bf16 %v162_v16, %v161_v15  ;;  %v164_v20 = vld [vmem:[%s1817_s4 + $0x18] sm:$0xff]  ;;  %v1033_v22 = vpack.c.bf16 %v76_v17, %v75_v14  ;;  %v165_v23 = vld [vmem:[%s1817_s4 + $0x20] sm:$0xff]  ;;  %v166_v24 = vld [vmem:[%s1817_s4 + $0x28] sm:$0xff] }
  0x22   :  { %v1048_v21 = vpack.c.bf16 %v164_v20, %v163_v19  ;;  %v77_v25 = vld [vmem:[%s1815_s2 + $0x50] sm:$0xff]  ;;  %v78_v26 = vld [vmem:[%s1815_s2 + $0x58] sm:$0xff]  ;;  %v1051_v27 = vpack.c.bf16 %v166_v24, %v165_v23  ;;  %v79_v31 = vld [vmem:[%s1815_s2 + $0x60] sm:$0xff] }
  0x23   :  { %1046 = vmatpush3.bf16.msra.mxu1 %v1045_v18  ;;  %v1036_v28 = vpack.c.bf16 %v78_v26, %v77_v25  ;;  %v167_v29 = vld [vmem:[%s1817_s4 + $0x30] sm:$0xff]  ;;  %v168_v30 = vld [vmem:[%s1817_s4 + $0x38] sm:$0xff]  ;;  %v80_v32 = vld [vmem:[%s1815_s2 + $0x68] sm:$0xff] }
  0x24   :  { %1025 = vmatpush3.bf16.msra.mxu0 %v1024_v7  ;;  %1047 = vmatprep.subr.bf16.mxu1 %v1307_v0  ;;  %v1054_v33 = vpack.c.bf16 %v168_v30, %v167_v29  ;;  %v1039_v34 = vpack.c.bf16 %v80_v32, %v79_v31  ;;  %v169_v35 = vld [vmem:[%s1817_s4 + $0x40] sm:$0xff]  ;;  %v170_v36 = vld [vmem:[%s1817_s4 + $0x48] sm:$0xff]  ;;  %v81_v37 = vld [vmem:[%s1815_s2 + $0x70] sm:$0xff] }
  0x25   :  { %1026 = vmatprep.subr.bf16.mxu0 %v1307_v0  ;;  %v82_v38 = vld [vmem:[%s1815_s2 + $0x78] sm:$0xff]  ;;  %v1057_v39 = vpack.c.bf16 %v170_v36, %v169_v35  ;;  %v171_v41 = vld [vmem:[%s1817_s4 + $0x50] sm:$0xff]  ;;  %v255_v43 = vld [vmem:[%s1819_s6] sm:$0xff] }
  0x26   :  { %v1042_v40 = vpack.c.bf16 %v82_v38, %v81_v37  ;;  %v172_v42 = vld [vmem:[%s1817_s4 + $0x58] sm:$0xff]  ;;  %v256_v44 = vld [vmem:[%s1819_s6 + $0x8] sm:$0xff]  ;;  %v66_v46 = vld [vmem:[%s1835_s23] sm:$0xff] }
  0x27   :  { %1049 = vmatpush3.bf16.msra.mxu1 %v1048_v21  ;;  %v1060_v45 = vpack.c.bf16 %v172_v42, %v171_v41  ;;  %v1069_v47 = vpack.c.bf16 %v256_v44, %v255_v43  ;;  %v173_v48 = vld [vmem:[%s1817_s4 + $0x60] sm:$0xff]  ;;  %v174_v49 = vld [vmem:[%s1817_s4 + $0x68] sm:$0xff]  ;;  %v257_v50 = vld [vmem:[%s1819_s6 + $0x10] sm:$0xff] }
  0x28   :  { %1028 = vmatpush3.bf16.msra.mxu0 %v1027_v10  ;;  %1050 = vmatprep.subr.bf16.mxu1 %v1307_v0  ;;  %v258_v51 = vld [vmem:[%s1819_s6 + $0x18] sm:$0xff]  ;;  %v1063_v52 = vpack.c.bf16 %v174_v49, %v173_v48  ;;  %v259_v54 = vld [vmem:[%s1819_s6 + $0x20] sm:$0xff]  ;;  %v260_v55 = vld [vmem:[%s1819_s6 + $0x28] sm:$0xff] }
  0x29   :  { %1029 = vmatprep.subr.bf16.mxu0 %v1307_v0  ;;  %v1072_v53 = vpack.c.bf16 %v258_v51, %v257_v50  ;;  %v1075_v56 = vpack.c.bf16 %v260_v55, %v259_v54  ;;  %v261_v57 = vld [vmem:[%s1819_s6 + $0x30] sm:$0xff]  ;;  %v262_v58 = vld [vmem:[%s1819_s6 + $0x38] sm:$0xff]  ;;  %v263_v60 = vld [vmem:[%s1819_s6 + $0x40] sm:$0xff] }
  0x2a   :  { %v1078_v59 = vpack.c.bf16 %v262_v58, %v261_v57  ;;  %v264_v61 = vld [vmem:[%s1819_s6 + $0x48] sm:$0xff]  ;;  %v265_v63 = vld [vmem:[%s1819_s6 + $0x50] sm:$0xff]  ;;  %v266_v2 = vld [vmem:[%s1819_s6 + $0x58] sm:$0xff] }
  0x2b   :  { %1052 = vmatpush3.bf16.msra.mxu1 %v1051_v27  ;;  %v1081_v62 = vpack.c.bf16 %v264_v61, %v263_v60  ;;  %v1084_v3 = vpack.c.bf16 %v266_v2, %v265_v63  ;;  %v267_v4 = vld [vmem:[%s1819_s6 + $0x60] sm:$0xff]  ;;  %v268_v5 = vld [vmem:[%s1819_s6 + $0x68] sm:$0xff]  ;;  %v269_v7 = vld [vmem:[%s1819_s6 + $0x70] sm:$0xff] }
  0x2c   :  { %1031 = vmatpush3.bf16.msra.mxu0 %v1030_v13  ;;  %1053 = vmatprep.subr.bf16.mxu1 %v1307_v0  ;;  %v1087_v6 = vpack.c.bf16 %v268_v5, %v267_v4  ;;  %v270_v8 = vld [vmem:[%s1819_s6 + $0x78] sm:$0xff]  ;;  %v254_v10 = vld [vmem:[#allocation2] sm:$0xff]  ;;  %v175_v11 = vld [vmem:[%s1817_s4 + $0x70] sm:$0xff] }
  0x2d   :  { %1032 = vmatprep.subr.bf16.mxu0 %v1307_v0  ;;  %v1090_v9 = vpack.c.bf16 %v270_v8, %v269_v7  ;;  %v176_v12 = vld [vmem:[%s1817_s4 + $0x78] sm:$0xff]  ;;  %v700_v14 = vld [vmem:[%s1816_s3] ss:$0 sm:$0xff]  ;;  %v350_v16 = vld [vmem:[%s1821_s8 + $0x8] sm:$0xff] }
  0x2e   :  { %v1066_v13 = vpack.c.bf16 %v176_v12, %v175_v11  ;;  %v349_v15 = vld [vmem:[%s1821_s8] sm:$0xff]  ;;  %v352_v23 = vld [vmem:[%s1821_s8 + $0x18] sm:$0xff]  ;;  %v354_v26 = vld [vmem:[%s1821_s8 + $0x28] sm:$0xff] }
  0x2f   :  { %1055 = vmatpush3.bf16.msra.mxu1 %v1054_v33  ;;  %v1093_v20 = vpack.c.bf16 %v350_v16, %v349_v15  ;;  %v353_v25 = vld [vmem:[%s1821_s8 + $0x20] sm:$0xff]  ;;  %v358_v31 = vld [vmem:[%s1821_s8 + $0x48] sm:$0xff]  ;;  %v359_v33 = vld [vmem:[%s1821_s8 + $0x50] sm:$0xff] }
  0x30   :  { %1034 = vmatpush3.bf16.msra.mxu0 %v1033_v22  ;;  %1056 = vmatprep.subr.bf16.mxu1 %v1307_v0  ;;  %v351_v22 = vld [vmem:[%s1821_s8 + $0x10] sm:$0xff]  ;;  %v1099_v27 = vpack.c.bf16 %v354_v26, %v353_v25  ;;  %v357_v30 = vld [vmem:[%s1821_s8 + $0x40] sm:$0xff]  ;;  %v362_v37 = vld [vmem:[%s1821_s8 + $0x68] sm:$0xff] }
  0x31   :  { %1035 = vmatprep.subr.bf16.mxu0 %v1307_v0  ;;  %v1096_v24 = vpack.c.bf16 %v352_v23, %v351_v22  ;;  %v1105_v32 = vpack.c.bf16 %v358_v31, %v357_v30  ;;  %v361_v36 = vld [vmem:[%s1821_s8 + $0x60] sm:$0xff]  ;;  %v445_v48 = vld [vmem:[%s1823_s10 + $0x8] sm:$0xff]  ;;  %v447_v50 = vld [vmem:[%s1823_s10 + $0x18] sm:$0xff] }
  0x32   :  { %v1111_v38 = vpack.c.bf16 %v362_v37, %v361_v36  ;;  %v702_v41 = vld [vmem:[%s1820_s7] ss:$0 sm:$0xff]  ;;  %v450_v55 = vld [vmem:[%s1823_s10 + $0x30] sm:$0xff]  ;;  %v547_v12 = vld [vmem:[%s1825_s12 + $0x18] sm:$0xff] }
  0x33   :  { %1058 = vmatpush3.bf16.msra.mxu1 %v1057_v39  ;;  %v363_v39 = vld [vmem:[%s1821_s8 + $0x70] sm:$0xff]  ;;  %v448_v51 = vld [vmem:[%s1823_s10 + $0x20] sm:$0xff]  ;;  %v549_v15 = vld [vmem:[%s1825_s12 + $0x28] sm:$0xff] }
  0x34   :  { %1037 = vmatpush3.bf16.msra.mxu0 %v1036_v28  ;;  %1059 = vmatprep.subr.bf16.mxu1 %v1307_v0  ;;  %v355_v28 = vld [vmem:[%s1821_s8 + $0x30] sm:$0xff]  ;;  %v452_v58 = vld [vmem:[%s1823_s10 + $0x40] sm:$0xff]  ;;  %v559_v37 = vld [vmem:[%s1825_s12 + $0x78] sm:$0xff] }
  0x35   :  { %1038 = vmatprep.subr.bf16.mxu0 %v1307_v0  ;;  %v454_v61 = vld [vmem:[%s1823_s10 + $0x50] sm:$0xff]  ;;  %v456_v2 = vld [vmem:[%s1823_s10 + $0x60] sm:$0xff] }
  0x36   :  { %v458_v5 = vld [vmem:[%s1823_s10 + $0x70] sm:$0xff]  ;;  %v544_v8 = vld [vmem:[%s1825_s12] sm:$0xff] }
  0x37   :  { %1061 = vmatpush3.bf16.msra.mxu1 %v1060_v45  ;;  %v554_v23 = vld [vmem:[%s1825_s12 + $0x50] sm:$0xff]  ;;  %v556_v26 = vld [vmem:[%s1825_s12 + $0x60] sm:$0xff] }
  0x38   :  { %1040 = vmatpush3.bf16.msra.mxu0 %v1039_v34  ;;  %1062 = vmatprep.subr.bf16.mxu1 %v1307_v0  ;;  %v360_v34 = vld [vmem:[%s1821_s8 + $0x58] sm:$0xff]  ;;  %v558_v36 = vld [vmem:[%s1825_s12 + $0x70] sm:$0xff] }
  0x39   :  { %1041 = vmatprep.subr.bf16.mxu0 %v1307_v0  ;;  %v1108_v35 = vpack.c.bf16 %v360_v34, %v359_v33 }
  0x3b   :  { %1064 = vmatpush3.bf16.msra.mxu1 %v1063_v52 }
  0x3c   :  { %1043 = vmatpush3.bf16.msra.mxu0 %v1042_v40  ;;  %1065 = vmatprep.subr.bf16.mxu1 %v1307_v0  ;;  %v364_v40 = vld [vmem:[%s1821_s8 + $0x78] sm:$0xff] }
  0x3d   :  { %1068 = vmatprep.subr.bf16.mxu0 %v1307_v0  ;;  %v1114_v42 = vpack.c.bf16 %v364_v40, %v363_v39  ;;  %v704_v39 = vld [vmem:[%s1824_s11] ss:$0 sm:$0xff] }
  0x3f   :  { %843 = vmatmul.mubr.f32.vlgmr.msra.gmra.mrb[0].mxu0 %v66_v46  ;;  %1067 = vmatpush3.bf16.msra.mxu1 %v1066_v13 }
  0x40   :  { %1070 = vmatpush3.bf16.msra.mxu0 %v1069_v47  ;;  %912 = vmatprep.mubr.msk.f32.mxu0 %vm1308_vm0, %v1309_v1  ;;  %v444_v47 = vld [vmem:[%s1823_s10] sm:$0xff] }
  0x41   :  { %1071 = vmatprep.subr.bf16.mxu0 %v1307_v0  ;;  %1092 = vmatprep.subr.bf16.mxu1 %v1307_v0  ;;  %v1116_v49 = vpack.c.bf16 %v445_v48, %v444_v47 }
  0x44   :  { %1073 = vmatpush3.bf16.msra.mxu0 %v1072_v53  ;;  %v449_v53 = vld [vmem:[%s1823_s10 + $0x28] sm:$0xff] }
  0x45   :  { %1074 = vmatprep.subr.bf16.mxu0 %v1307_v0  ;;  %v1124_v54 = vpack.c.bf16 %v449_v53, %v448_v51 }
  0x48   :  { %1076 = vmatpush3.bf16.msra.mxu0 %v1075_v56  ;;  %v451_v56 = vld [vmem:[%s1823_s10 + $0x38] sm:$0xff] }
  0x49   :  { %1077 = vmatprep.subr.bf16.mxu0 %v1307_v0  ;;  %v1128_v57 = vpack.c.bf16 %v451_v56, %v450_v55 }
  0x4c   :  { %1079 = vmatpush3.bf16.msra.mxu0 %v1078_v59  ;;  %v453_v59 = vld [vmem:[%s1823_s10 + $0x48] sm:$0xff] }
  0x4d   :  { %1080 = vmatprep.subr.bf16.mxu0 %v1307_v0  ;;  %v1132_v60 = vpack.c.bf16 %v453_v59, %v452_v58 }
  0x50   :  { %1082 = vmatpush3.bf16.msra.mxu0 %v1081_v62  ;;  %v455_v62 = vld [vmem:[%s1823_s10 + $0x58] sm:$0xff] }
  0x51   :  { %1083 = vmatprep.subr.bf16.mxu0 %v1307_v0  ;;  %v1136_v63 = vpack.c.bf16 %v455_v62, %v454_v61 }
  0x54   :  { %1085 = vmatpush3.bf16.msra.mxu0 %v1084_v3  ;;  %v457_v3 = vld [vmem:[%s1823_s10 + $0x68] sm:$0xff] }
  0x55   :  { %1086 = vmatprep.subr.bf16.mxu0 %v1307_v0  ;;  %v1140_v4 = vpack.c.bf16 %v457_v3, %v456_v2 }
  0x58   :  { %1088 = vmatpush3.bf16.msra.mxu0 %v1087_v6  ;;  %v459_v6 = vld [vmem:[%s1823_s10 + $0x78] sm:$0xff] }
  0x59   :  { %1089 = vmatprep.subr.bf16.mxu0 %v1307_v0  ;;  %v1144_v7 = vpack.c.bf16 %v459_v6, %v458_v5 }
  0x5c   :  { %1091 = vmatpush3.bf16.msra.mxu0 %v1090_v9  ;;  %v545_v9 = vld [vmem:[%s1825_s12 + $0x8] sm:$0xff] }
  0x5d   :  { %1117 = vmatprep.subr.bf16.mxu0 %v1116_v49  ;;  %v1148_v11 = vpack.c.bf16 %v545_v9, %v544_v8 }
  0x5f   :  { %913 = vmatmul.mubr.f32.vlgmr.msra.gmra.mrb[2].mxu0 %v254_v10  ;;  %v546_v10 = vld [vmem:[%s1825_s12 + $0x10] sm:$0xff] }
  0x60   :  { %1119 = vmatpush3.bf16.msra.mxu0 %v1116_v49  ;;  %v1152_v13 = vpack.c.bf16 %v547_v12, %v546_v10 }
 0x112   :  { %v156_v17 = vpop.f32.mrb[0].mxu0 }
 0x113   :  { %v157_v18 = vadd.f32 %v700_v14, %v156_v17  ;;  %v844_v19 = vpop.f32.mrb[1].mxu0  ;;  %v548_v14 = vld [vmem:[%s1825_s12 + $0x20] sm:$0xff]  ;;  %v550_v17 = vld [vmem:[%s1825_s12 + $0x30] sm:$0xff] }
 0x114   :  { %v1156_v16 = vpack.c.bf16 %v549_v15, %v548_v14 }
 0x115   :  { %v160_v21 = vmax.f32 %v157_v18, 0.0  ;;  %v551_v18 = vld [vmem:[%s1825_s12 + $0x38] sm:$0xff] }
 0x116   :  { %v1160_v19 = vpack.c.bf16 %v551_v18, %v550_v17 }
 0x117   :  { %878 = vmatmul.mubr.f32.vlgmr.msra.gmra.mrb[0].mxu1 %v160_v21  ;;  %v553_v21 = vld [vmem:[%s1825_s12 + $0x48] sm:$0xff] }
 0x118   :  { %1094 = vmatpush3.bf16.msra.mxu1 %v1093_v20  ;;  %947 = vmatprep.mubr.msk.f32.mxu1 %vm1308_vm0, %v1309_v1  ;;  %v356_v1 = vld [vmem:[%s1821_s8 + $0x38] sm:$0xff]  ;;  %v552_v20 = vld [vmem:[%s1825_s12 + $0x40] sm:$0xff] }
 0x119   :  { %1095 = vmatprep.subr.bf16.mxu1 %v1307_v0  ;;  %v1102_v29 = vpack.c.bf16 %v356_v1, %v355_v28  ;;  %v1164_v22 = vpack.c.bf16 %v553_v21, %v552_v20  ;;  %v701_v1 = vld [vmem:[%s1818_s5] ss:$0 sm:$0xff] }
 0x11c   :  { %1097 = vmatpush3.bf16.msra.mxu1 %v1096_v24  ;;  %v555_v24 = vld [vmem:[%s1825_s12 + $0x58] sm:$0xff] }
 0x11d   :  { %1098 = vmatprep.subr.bf16.mxu1 %v1307_v0  ;;  %v1168_v25 = vpack.c.bf16 %v555_v24, %v554_v23 }
 0x120   :  { %1100 = vmatpush3.bf16.msra.mxu1 %v1099_v27  ;;  %v557_v27 = vld [vmem:[%s1825_s12 + $0x68] sm:$0xff]  ;;  %s650_s12 = sshll.u32 %s1311_s28, 4  ;;  %s651_s12 = int_to_ptr.vmem [resolvable:$true] %s650_s12 }
 0x121   :  { %1101 = vmatprep.subr.bf16.mxu1 %v1307_v0  ;;  %v1172_v28 = vpack.c.bf16 %v557_v27, %v556_v26 }
 0x124   :  { %1103 = vmatpush3.bf16.msra.mxu1 %v1102_v29 }
 0x125   :  { %1104 = vmatprep.subr.bf16.mxu1 %v1307_v0 }
 0x128   :  { %1106 = vmatpush3.bf16.msra.mxu1 %v1105_v32  ;;  %v703_v32 = vld [vmem:[%s1822_s9] ss:$0 sm:$0xff]  ;;  %s1310_s9 = smov [#allocation6]  }
 0x129   :  { %1107 = vmatprep.subr.bf16.mxu1 %v1307_v0  ;;  %s660_s7 = sshll.u32 %s1310_s9, 4  ;;  %s661_s7 = int_to_ptr.vmem [resolvable:$true] %s660_s7 }
 0x12a   :  { %s1210_s29 = scalar_lea.vmem %s661_s7, 128  ;;  %p1215_p9 = scmp.lt.s32.totalorder %s661_s7, %s661_s7 }
 0x12b   :  { %p1211_p8 = scmp.ne.s32.totalorder %s661_s7, %s1210_s29  ;;  %p1216_p10 = scmp.lt.s32.totalorder %s1210_s29, %s1210_s29 }
 0x12c   :  { %1109 = vmatpush3.bf16.msra.mxu1 %v1108_v35 }
 0x12d   :  { %1110 = vmatprep.subr.bf16.mxu1 %v1307_v0  ;;  %p1217_p11 = por %p1216_p10, %p1215_p9 }
 0x12f   :  { %p1218_p12 = pnand %p1217_p11, %p1211_p8 }
 0x130   :  { %1112 = vmatpush3.bf16.msra.mxu1 %v1111_v38  ;;  %v1176_v38 = vpack.c.bf16 %v559_v37, %v558_v36 }
 0x131   :  { %1113 = vmatprep.subr.bf16.mxu1 %v1307_v0  ;;  %v446_v0 = vld [vmem:[%s1823_s10 + $0x10] sm:$0xff] }
 0x132   :  { %v344_v43 = vpop.f32.mrb[2].mxu0  ;;  %v1120_v52 = vpack.c.bf16 %v447_v50, %v446_v0 }
 0x133   :  { %v345_v44 = vadd.f32 %v702_v41, %v344_v43  ;;  %v914_v45 = vpop.f32.mrb[3].mxu0 }
 0x134   :  { %1115 = vmatpush3.bf16.msra.mxu1 %v1114_v42  ;;  %1121 = vmatprep.subr.bf16.mxu0 %v1120_v52 }
 0x135   :  { %v348_v46 = vmax.f32 %v345_v44, 0.0  ;;  %1123 = vmatpush3.bf16.msra.mxu0 %v1120_v52  ;;  %1149 = vmatprep.subr.bf16.mxu1 %v1148_v11 }
 0x136   :  { %1125 = vmatprep.subr.bf16.mxu0 %v1124_v54 }
 0x137   :  { %948 = vmatmul.mubr.f32.vlgmr.msra.gmra.mrb[2].mxu1 %v348_v46 }
 0x138   :  { %1151 = vmatpush3.bf16.msra.mxu1 %v1148_v11 }
 0x139   :  { %1127 = vmatpush3.bf16.msra.mxu0 %v1124_v54  ;;  %1153 = vmatprep.subr.bf16.mxu1 %v1152_v13 }
 0x13a   :  { %1129 = vmatprep.subr.bf16.mxu0 %v1128_v57 }
 0x13c   :  { %1155 = vmatpush3.bf16.msra.mxu1 %v1152_v13 }
 0x13d   :  { %1131 = vmatpush3.bf16.msra.mxu0 %v1128_v57  ;;  %1157 = vmatprep.subr.bf16.mxu1 %v1156_v16 }
 0x13e   :  { %1133 = vmatprep.subr.bf16.mxu0 %v1132_v60 }
 0x140   :  { %1159 = vmatpush3.bf16.msra.mxu1 %v1156_v16 }
 0x141   :  { %1135 = vmatpush3.bf16.msra.mxu0 %v1132_v60  ;;  %1161 = vmatprep.subr.bf16.mxu1 %v1160_v19 }
 0x142   :  { %1137 = vmatprep.subr.bf16.mxu0 %v1136_v63 }
 0x144   :  { %1163 = vmatpush3.bf16.msra.mxu1 %v1160_v19 }
 0x145   :  { %1139 = vmatpush3.bf16.msra.mxu0 %v1136_v63  ;;  %1165 = vmatprep.subr.bf16.mxu1 %v1164_v22 }
 0x146   :  { %1141 = vmatprep.subr.bf16.mxu0 %v1140_v4 }
 0x148   :  { %1167 = vmatpush3.bf16.msra.mxu1 %v1164_v22 }
 0x149   :  { %1143 = vmatpush3.bf16.msra.mxu0 %v1140_v4  ;;  %1169 = vmatprep.subr.bf16.mxu1 %v1168_v25 }
 0x14a   :  { %1145 = vmatprep.subr.bf16.mxu0 %v1144_v7 }
 0x14c   :  { %1171 = vmatpush3.bf16.msra.mxu1 %v1168_v25 }
 0x14d   :  { %1147 = vmatpush3.bf16.msra.mxu0 %v1144_v7  ;;  %1173 = vmatprep.subr.bf16.mxu1 %v1172_v28 }
 0x150   :  { %1175 = vmatpush3.bf16.msra.mxu1 %v1172_v28 }
 0x151   :  { %1177 = vmatprep.subr.bf16.mxu1 %v1176_v38 }
 0x154   :  { %1179 = vmatpush3.bf16.msra.mxu1 %v1176_v38 }
 0x1ea   :  { %v250_v29 = vpop.f32.mrb[0].mxu1 }
 0x1eb   :  { %v251_v30 = vadd.f32 %v701_v1, %v250_v29  ;;  %v879_v31 = vpop.f32.mrb[1].mxu1 }
 0x1ed   :  { %442 = vst [vmem:[#allocation5] sm:$0xff] %v251_v30  ;;  %982 = vmatprep.mubr.f32.mxu0 %v251_v30 }
 0x20a   :  { %v438_v33 = vpop.f32.mrb[2].mxu1 }
 0x20b   :  { %v439_v34 = vadd.f32 %v703_v32, %v438_v33  ;;  %v949_v35 = vpop.f32.mrb[3].mxu1 }
 0x20d   :  { %443 = vst [vmem:[#allocation6] sm:$0xff] %v439_v34  ;;  %983 = vmatmul.mubr.f32.vlgmr.msra.gmra.mrb[4].mxu0 %v439_v34 }
 0x2e0   :  { %v984_v40 = vpop.f32.mrb[4].mxu0 }
 0x2e1   :  { %v539_v41 = vadd.f32 %v984_v40, %v704_v39  ;;  %v533_v42 = vpop.f32.mrb[5].mxu0 }
 0x2e2   :  { %v534_v43 = vadd.f32 %v704_v39, %v533_v42 }
 0x2e3   :  { %v543_v45 = vmax.f32 %v539_v41, 0.0 }
 0x2e4   :  { %v542_v44 = vmax.f32 %v534_v43, 0.0 }
 0x2e6   :  { %1017 = vmatprep.mubr.f32.mxu1 %v542_v44 }
 0x2e7   :  { %1018 = vmatmul.mubr.f32.vlgmr.msra.gmra.mrb[4].mxu1 %v543_v45 }
 0x2e8   :  { %1221 = shalt.err (!%p1218_p12)
}
 0x2e9   :  { %s1222_s30 = scalar_lea.hbm %s1828_s15, 128 }
 0x2ea   :  { %p1223_p13 = scmp.ne.s32.totalorder %s1828_s15, %s1222_s30  ;;  %p1226_p0 = scmp.lt.u32.totalorder %s1222_s30, %s1828_s15 }
 0x2ec   :  { %p1228_p1 = pnand %p1226_p0, %p1223_p13 }
 0x2ee   :  { %1231 = shalt.err (!%p1228_p1)
}
 0x2ef   :  { %663 = dma.vmem_to_hbm [thread:$0]  %s661_s7, 128, %s1828_s15, [#allocation7]  }
 0x2f0   :  { %s1232_s20 = scalar_lea.vmem %s651_s12, 128  ;;  %p1237_p3 = scmp.lt.s32.totalorder %s651_s12, %s651_s12 }
 0x2f1   :  { %p1233_p2 = scmp.ne.s32.totalorder %s651_s12, %s1232_s20  ;;  %p1238_p4 = scmp.lt.s32.totalorder %s1232_s20, %s1232_s20 }
 0x2f3   :  { %p1239_p5 = por %p1238_p4, %p1237_p3 }
 0x2f5   :  { %p1240_p6 = pnand %p1239_p5, %p1233_p2 }
 0x2f7   :  { %1243 = shalt.err (!%p1240_p6)
}
 0x2f8   :  { %s1244_s22 = scalar_lea.hbm %s1827_s14, 128 }
 0x2f9   :  { %p1245_p7 = scmp.ne.s32.totalorder %s1827_s14, %s1244_s22  ;;  %p1248_p8 = scmp.lt.u32.totalorder %s1244_s22, %s1827_s14 }
 0x2fb   :  { %p1250_p9 = pnand %p1248_p8, %p1245_p7 }
 0x2fd   :  { %1253 = shalt.err (!%p1250_p9)
}
 0x2fe   :  { %653 = dma.vmem_to_hbm [thread:$0]  %s651_s12, 128, %s1827_s14, [#allocation4]   ;;  %v705_v46 = vld [vmem:[%s1826_s13] ss:$0 sm:$0xff] }
 0x2ff   :  { %s1312_s8 = smov [#allocation9]   ;;  %s1313_s7 = smov [#allocation8]  }
 0x300   :  { %s680_s9 = sshll.u32 %s1312_s8, 4  ;;  %s670_s28 = sshll.u32 %s1313_s7, 4  ;;  %s681_s9 = int_to_ptr.vmem [resolvable:$true] %s680_s9  ;;  %s671_s28 = int_to_ptr.vmem [resolvable:$true] %s670_s28 }
 0x301   :  { %s1254_s29 = scalar_lea.vmem %s681_s9, 128  ;;  %p1259_p11 = scmp.lt.s32.totalorder %s681_s9, %s681_s9 }
 0x302   :  { %p1255_p10 = scmp.ne.s32.totalorder %s681_s9, %s1254_s29  ;;  %p1260_p12 = scmp.lt.s32.totalorder %s1254_s29, %s1254_s29 }
 0x304   :  { %p1261_p13 = por %p1260_p12, %p1259_p11 }
 0x306   :  { %p1262_p0 = pnand %p1261_p13, %p1255_p10 }
 0x3ba   :  { %v1019_v47 = vpop.f32.mrb[4].mxu1 }
 0x3bb   :  { %v639_v48 = vadd.f32 %v1019_v47, %v705_v46  ;;  %v633_v49 = vpop.f32.mrb[5].mxu1 }
 0x3bc   :  { %v634_v0 = vadd.f32 %v705_v46, %v633_v49 }
 0x3bd   :  { %643 = vst [vmem:[#allocation9] sm:$0xff] %v639_v48 }
 0x3be   :  { %642 = vst [vmem:[#allocation8] sm:$0xff] %v634_v0 }
 0x3bf   :  { %1265 = shalt.err (!%p1262_p0)
}
 0x3c0   :  { %s1266_s12 = scalar_lea.hbm %s1830_s17, 128 }
 0x3c1   :  { %p1267_p1 = scmp.ne.s32.totalorder %s1830_s17, %s1266_s12  ;;  %p1270_p2 = scmp.lt.u32.totalorder %s1266_s12, %s1830_s17 }
 0x3c3   :  { %p1272_p3 = pnand %p1270_p2, %p1267_p1 }
 0x3c5   :  { %1275 = shalt.err (!%p1272_p3)
}
 0x3c6   :  { %683 = dma.vmem_to_hbm [thread:$0]  %s681_s9, 128, %s1830_s17, [#allocation10]  }
 0x3c7   :  { %s1276_s1 = scalar_lea.vmem %s671_s28, 128  ;;  %p1281_p5 = scmp.lt.s32.totalorder %s671_s28, %s671_s28 }
 0x3c8   :  { %p1277_p4 = scmp.ne.s32.totalorder %s671_s28, %s1276_s1  ;;  %p1282_p6 = scmp.lt.s32.totalorder %s1276_s1, %s1276_s1 }
 0x3ca   :  { %p1283_p7 = por %p1282_p6, %p1281_p5 }
 0x3cc   :  { %p1284_p8 = pnand %p1283_p7, %p1277_p4 }
 0x3ce   :  { %1287 = shalt.err (!%p1284_p8)
}
 0x3cf   :  { %s1288_s20 = scalar_lea.hbm %s1829_s16, 128 }
 0x3d0   :  { %p1289_p9 = scmp.ne.s32.totalorder %s1829_s16, %s1288_s20  ;;  %p1292_p10 = scmp.lt.u32.totalorder %s1288_s20, %s1829_s16 }
 0x3d2   :  { %p1294_p11 = pnand %p1292_p10, %p1289_p9 }
 0x3d4   :  { %1297 = shalt.err (!%p1294_p11)
}
 0x3d5   :  { %673 = dma.vmem_to_hbm [thread:$0]  %s671_s28, 128, %s1829_s16, [#allocation7]  }
 0x3d6   :  { %1300 = dma.done.wait [#allocation4], 128  }
 0x3d7   :  { %1301 = vsyncadd [#allocation4], 4294967168 }
 0x3d8   :  { %1302 = dma.done.wait [#allocation7], 256  }
 0x3d9   :  { %1303 = vsyncadd [#allocation7], 4294967040 }
 0x3da   :  { %1304 = dma.done.wait [#allocation10], 128  }
 0x3db   :  { %1305 = vsyncadd [#allocation10], 4294967168 }
 0x3dc   :  { %696 = vsyncpa [#allocation3], 1 }
 0x3dd   :  { %697 = vsyncpa [#allocation4], 1 }
 0x3de   :  { %698 = vsyncpa [#allocation7], 1 }
 0x3df   :  { %699 = vsyncpa [#allocation10], 1 }

</bundles_post_ra>
